<compile_context>
chip_gen: v5e
topology: v5e:2x2
jax: 0.10.0
libtpu: 0.0.40
codegen_flags: <defaults>
</compile_context>

<pallas_src>
import functools

import jax
import jax.numpy as jnp
from jax import lax
from jax.experimental import pallas as pl
from jax.experimental.pallas import tpu as pltpu

HIDDEN = 32
DROP_P = 0.1
EPS = 1e-5  # nn.LayerNorm default eps


def _hash_u32(x):
    """lowbias32-style integer mixer (uint32 -> uint32), pure VPU ops."""
    x = x ^ (x >> jnp.uint32(16))
    x = x * jnp.uint32(0x7FEB352D)
    x = x ^ (x >> jnp.uint32(15))
    x = x * jnp.uint32(0x846CA68B)
    x = x ^ (x >> jnp.uint32(16))
    return x


def residual_kernel(seed_ref, x_ref, gamma_ref, beta_ref, w_ref, b_ref, o_ref,
                    *, drop_p):
    # x_ref: (TM, H) tile of the flattened input
    x = x_ref[...].astype(jnp.float32)

    # --- LayerNorm over the hidden (last) dim ---
    mean = jnp.mean(x, axis=-1, keepdims=True)
    cen = x - mean
    var = jnp.mean(cen * cen, axis=-1, keepdims=True)
    y = cen * lax.rsqrt(var + EPS) * gamma_ref[...] + beta_ref[...]

    # --- sublayer: Linear(H, H) on the MXU ---
    t = jnp.dot(y, w_ref[...], preferred_element_type=jnp.float32) + b_ref[...]

    # --- Dropout (training-mode, inverted scaling) ---
    # Stateless counter-based hash of the GLOBAL element index + seed, so the
    # mask is independent of tile_rows / grid layout and lowers on any backend.
    tm, h = t.shape
    row0 = pl.program_id(0) * tm
    rows = row0 + lax.broadcasted_iota(jnp.int32, (tm, h), 0)
    cols = lax.broadcasted_iota(jnp.int32, (tm, h), 1)
    flat = (rows * h + cols).astype(jnp.uint32)
    seed = seed_ref[0].astype(jnp.uint32) * jnp.uint32(0x9E3779B9)
    bits = _hash_u32(flat + seed)
    r31 = (bits >> jnp.uint32(1)).astype(jnp.int32)          # uniform in [0, 2^31)
    thresh = jnp.int32(int(round(drop_p * (1 << 31))))        # P(keep) = 1 - p
    keep = r31 >= thresh
    t = jnp.where(keep, t * (1.0 / (1.0 - drop_p)), 0.0)

    # --- residual add ---
    o_ref[...] = (x + t).astype(o_ref.dtype)


def residual_forward(x, gamma, beta, w, b, seed, *, tile_rows=4096,
                     drop_p=DROP_P):
    """x: [N, H] flattened activations; returns [N, H]."""
    N, H = x.shape

    # Pick a big row tile (amortizes per-grid-step overhead), clamp to the
    # (row-padded) problem size and keep it a multiple of 8 sublanes.
    n_pad8 = pl.cdiv(N, 8) * 8
    tm = min(int(tile_rows), n_pad8)
    tm = pl.cdiv(tm, 8) * 8
    n_total = pl.cdiv(n_pad8, tm) * tm

    if n_total != N:
        x_p = jnp.zeros((n_total, H), x.dtype).at[:N, :].set(x)
    else:
        x_p = x

    grid = (n_total // tm,)
    kernel = functools.partial(residual_kernel, drop_p=drop_p)

    out = pl.pallas_call(
        kernel,
        out_shape=jax.ShapeDtypeStruct((n_total, H), x.dtype),
        grid_spec=pltpu.PrefetchScalarGridSpec(
            num_scalar_prefetch=1,
            grid=grid,
            in_specs=[
                pl.BlockSpec((tm, H), lambda i, seed: (i, 0)),   # x tile
                pl.BlockSpec((1, H), lambda i, seed: (0, 0)),    # gamma
                pl.BlockSpec((1, H), lambda i, seed: (0, 0)),    # beta
                pl.BlockSpec((H, H), lambda i, seed: (0, 0)),    # W
                pl.BlockSpec((1, H), lambda i, seed: (0, 0)),    # bias
            ],
            out_specs=pl.BlockSpec((tm, H), lambda i, seed: (i, 0)),
        ),
        compiler_params=pltpu.CompilerParams(
            # Stateless dropout -> grid steps independent -> shard across
            # v7x's two TensorCores; no-op on single-TC v5e/v6e.
            dimension_semantics=("parallel",),
        ),
    )(seed, x_p, gamma, beta, w, b)

    return out[:N, :] if n_total != N else out


def residual_module(x_bsh, gamma, beta, w, b, seed):
    """Residual.forward for x of shape [batch, seq, hidden] with sublayer=Linear."""
    B, S, H = x_bsh.shape
    x_flat = x_bsh.reshape(B * S, H)
    out = residual_forward(x_flat, gamma, beta, w, b, seed)
    return out.reshape(B, S, H)


if __name__ == "__main__":
    batch, seq, hidden = 2, 8, HIDDEN

    key = jax.random.PRNGKey(0)
    k_x, k_w, k_b = jax.random.split(key, 3)

    x = jax.random.normal(k_x, (batch, seq, hidden), dtype=jnp.float32)

    # LayerNorm params (PyTorch default init: weight=1, bias=0)
    gamma = jnp.ones((1, hidden), dtype=jnp.float32)
    beta = jnp.zeros((1, hidden), dtype=jnp.float32)

    # Deterministic sublayer = Linear(hidden, hidden)
    w = jax.random.normal(k_w, (hidden, hidden), dtype=jnp.float32) * (1.0 / hidden**0.5)
    b = jax.random.normal(k_b, (1, hidden), dtype=jnp.float32) * 0.01

    seed = jnp.array([0], dtype=jnp.int32)

    # TODO(synk): nn.Dropout eval-mode bypass is not modeled; kernel always runs
    # training-mode dropout, matching Residual.forward under model.train().
    out = residual_module(x, gamma, beta, w, b, seed)
    jax.block_until_ready(out)

    assert out.shape == (batch, seq, hidden)
    assert out.dtype == x.dtype
    assert bool(jnp.all(jnp.isfinite(out)))
    print("KERNEL_OK")
</pallas_src>

<mosaic_0001>
module attributes {stable_mosaic.version = 11 : i64} {
  func.func @residual_kernel(%arg0: i32, %arg1: memref<1xi32, #tpu.memory_space<smem>>, %arg2: memref<16x32xf32, #tpu.memory_space<vmem>>, %arg3: memref<1x32xf32, #tpu.memory_space<vmem>>, %arg4: memref<1x32xf32, #tpu.memory_space<vmem>>, %arg5: memref<32x32xf32, #tpu.memory_space<vmem>>, %arg6: memref<1x32xf32, #tpu.memory_space<vmem>>, %arg7: memref<16x32xf32, #tpu.memory_space<vmem>>) attributes {dimension_semantics = [#tpu.dimension_semantics<parallel>], iteration_bounds = array<i64: 1>, scalar_prefetch = 1 : i64, scratch_operands = 0 : i64, tpu.core_type = #tpu.core_type<tc>, window_params = [{transform_indices = @transform_0, window_bounds = array<i64: 16, 32>}, {pipeline_mode = #tpu.pipeline_mode<synchronous>, transform_indices = @transform_1, window_bounds = array<i64: 1, 32>}, {pipeline_mode = #tpu.pipeline_mode<synchronous>, transform_indices = @transform_2, window_bounds = array<i64: 1, 32>}, {pipeline_mode = #tpu.pipeline_mode<synchronous>, transform_indices = @transform_3, window_bounds = array<i64: 32, 32>}, {pipeline_mode = #tpu.pipeline_mode<synchronous>, transform_indices = @transform_4, window_bounds = array<i64: 1, 32>}, {transform_indices = @transform_5, window_bounds = array<i64: 16, 32>}]} {
    %c0 = arith.constant 0 : index
    %c0_0 = arith.constant 0 : index
    %0 = vector.load %arg2[%c0, %c0_0] : memref<16x32xf32, #tpu.memory_space<vmem>>, vector<16x32xf32>
    %cst = arith.constant dense<0.000000e+00> : vector<16xf32>
    %1 = vector.multi_reduction <add>, %0, %cst [1] : vector<16x32xf32> to vector<16xf32>
    %2 = vector.shape_cast %1 : vector<16xf32> to vector<16x1xf32>
    %cst_1 = arith.constant 3.200000e+01 : f32
    %3 = vector.broadcast %cst_1 : f32 to vector<16x1xf32>
    %4 = arith.divf %2, %3 : vector<16x1xf32>
    %5 = vector.broadcast %4 : vector<16x1xf32> to vector<16x32xf32>
    %6 = arith.subf %0, %5 : vector<16x32xf32>
    %7 = arith.mulf %6, %6 : vector<16x32xf32>
    %cst_2 = arith.constant dense<0.000000e+00> : vector<16xf32>
    %8 = vector.multi_reduction <add>, %7, %cst_2 [1] : vector<16x32xf32> to vector<16xf32>
    %9 = vector.shape_cast %8 : vector<16xf32> to vector<16x1xf32>
    %cst_3 = arith.constant 3.200000e+01 : f32
    %10 = vector.broadcast %cst_3 : f32 to vector<16x1xf32>
    %11 = arith.divf %9, %10 : vector<16x1xf32>
    %cst_4 = arith.constant 9.99999974E-6 : f32
    %12 = vector.broadcast %cst_4 : f32 to vector<16x1xf32>
    %13 = arith.addf %11, %12 : vector<16x1xf32>
    %14 = math.rsqrt %13 : vector<16x1xf32>
    %15 = vector.broadcast %14 : vector<16x1xf32> to vector<16x32xf32>
    %16 = arith.mulf %6, %15 : vector<16x32xf32>
    %c0_5 = arith.constant 0 : index
    %c0_6 = arith.constant 0 : index
    %17 = vector.load %arg3[%c0_5, %c0_6] : memref<1x32xf32, #tpu.memory_space<vmem>>, vector<1x32xf32>
    %18 = vector.broadcast %17 : vector<1x32xf32> to vector<16x32xf32>
    %19 = arith.mulf %16, %18 : vector<16x32xf32>
    %c0_7 = arith.constant 0 : index
    %c0_8 = arith.constant 0 : index
    %20 = vector.load %arg4[%c0_7, %c0_8] : memref<1x32xf32, #tpu.memory_space<vmem>>, vector<1x32xf32>
    %21 = vector.broadcast %20 : vector<1x32xf32> to vector<16x32xf32>
    %22 = arith.addf %19, %21 : vector<16x32xf32>
    %c0_9 = arith.constant 0 : index
    %c0_10 = arith.constant 0 : index
    %23 = vector.load %arg5[%c0_9, %c0_10] : memref<32x32xf32, #tpu.memory_space<vmem>>, vector<32x32xf32>
    %cst_11 = arith.constant dense<0.000000e+00> : vector<16x32xf32>
    %24 = tpu.matmul %22, %23, %cst_11 {dimension_numbers = #tpu.dot_dimension_numbers<[1], [0], [0], [1], [0, 0, 1, 1], [], []>} : vector<16x32xf32>, vector<32x32xf32>, vector<16x32xf32> -> vector<16x32xf32>
    %c0_12 = arith.constant 0 : index
    %c0_13 = arith.constant 0 : index
    %25 = vector.load %arg6[%c0_12, %c0_13] : memref<1x32xf32, #tpu.memory_space<vmem>>, vector<1x32xf32>
    %26 = vector.broadcast %25 : vector<1x32xf32> to vector<16x32xf32>
    %27 = arith.addf %24, %26 : vector<16x32xf32>
    %c16_i32 = arith.constant 16 : i32
    %28 = arith.muli %arg0, %c16_i32 : i32
    %29 = tpu.iota {dimensions = array<i32: 0>} : vector<16x32xi32>
    %30 = vector.broadcast %28 : i32 to vector<16x32xi32>
    %31 = arith.addi %30, %29 : vector<16x32xi32>
    %32 = tpu.iota {dimensions = array<i32: 1>} : vector<16x32xi32>
    %c32_i32 = arith.constant 32 : i32
    %33 = vector.broadcast %c32_i32 : i32 to vector<16x32xi32>
    %34 = arith.muli %31, %33 : vector<16x32xi32>
    %35 = arith.addi %34, %32 : vector<16x32xi32>
    %c0_14 = arith.constant 0 : index
    %36 = memref.load %arg1[%c0_14] : memref<1xi32, #tpu.memory_space<smem>>
    %c-1640531527_i32 = arith.constant -1640531527 : i32
    %37 = arith.muli %36, %c-1640531527_i32 : i32
    %38 = vector.broadcast %37 : i32 to vector<16x32xi32>
    %39 = arith.addi %35, %38 : vector<16x32xi32>
    %c16_i32_15 = arith.constant 16 : i32
    %40 = vector.broadcast %c16_i32_15 : i32 to vector<16x32xi32>
    %41 = arith.shrui %39, %40 : vector<16x32xi32>
    %42 = arith.xori %39, %41 : vector<16x32xi32>
    %c2146121005_i32 = arith.constant 2146121005 : i32
    %43 = vector.broadcast %c2146121005_i32 : i32 to vector<16x32xi32>
    %44 = arith.muli %42, %43 : vector<16x32xi32>
    %c15_i32 = arith.constant 15 : i32
    %45 = vector.broadcast %c15_i32 : i32 to vector<16x32xi32>
    %46 = arith.shrui %44, %45 : vector<16x32xi32>
    %47 = arith.xori %44, %46 : vector<16x32xi32>
    %c-2073254261_i32 = arith.constant -2073254261 : i32
    %48 = vector.broadcast %c-2073254261_i32 : i32 to vector<16x32xi32>
    %49 = arith.muli %47, %48 : vector<16x32xi32>
    %c16_i32_16 = arith.constant 16 : i32
    %50 = vector.broadcast %c16_i32_16 : i32 to vector<16x32xi32>
    %51 = arith.shrui %49, %50 : vector<16x32xi32>
    %52 = arith.xori %49, %51 : vector<16x32xi32>
    %c1_i32 = arith.constant 1 : i32
    %53 = vector.broadcast %c1_i32 : i32 to vector<16x32xi32>
    %54 = arith.shrui %52, %53 : vector<16x32xi32>
    %c214748365_i32 = arith.constant 214748365 : i32
    %55 = vector.broadcast %c214748365_i32 : i32 to vector<16x32xi32>
    %56 = arith.cmpi sge, %54, %55 : vector<16x32xi32>
    %cst_17 = arith.constant 1.11111116 : f32
    %57 = vector.broadcast %cst_17 : f32 to vector<16x32xf32>
    %58 = arith.mulf %27, %57 : vector<16x32xf32>
    %cst_18 = arith.constant 0.000000e+00 : f32
    %59 = vector.broadcast %cst_18 : f32 to vector<16x32xf32>
    %60 = arith.select %56, %58, %59 : vector<16x32xi1>, vector<16x32xf32>
    %61 = arith.addf %0, %60 : vector<16x32xf32>
    %c0_19 = arith.constant 0 : index
    %c0_20 = arith.constant 0 : index
    %62 = vector.load %arg7[%c0_19, %c0_20] : memref<16x32xf32, #tpu.memory_space<vmem>>, vector<16x32xf32>
    tpu.vector_store %arg7[%c0_19, %c0_20], %61 {strides = array<i32>} : memref<16x32xf32, #tpu.memory_space<vmem>>, vector<16x32xf32>,
    return
  }
  func.func @transform_0(%arg0: i32, %arg1: memref<1xi32, #tpu.memory_space<smem>>) -> (i32, i32) {
    %c0_i32 = arith.constant 0 : i32
    %c0_i32_0 = arith.constant 0 : i32
    return %arg0, %c0_i32 : i32, i32
  }
  func.func @transform_1(%arg0: i32, %arg1: memref<1xi32, #tpu.memory_space<smem>>) -> (i32, i32) {
    %c0_i32 = arith.constant 0 : i32
    %c0_i32_0 = arith.constant 0 : i32
    %c0_i32_1 = arith.constant 0 : i32
    return %c0_i32, %c0_i32_0 : i32, i32
  }
  func.func @transform_2(%arg0: i32, %arg1: memref<1xi32, #tpu.memory_space<smem>>) -> (i32, i32) {
    %c0_i32 = arith.constant 0 : i32
    %c0_i32_0 = arith.constant 0 : i32
    %c0_i32_1 = arith.constant 0 : i32
    return %c0_i32, %c0_i32_0 : i32, i32
  }
  func.func @transform_3(%arg0: i32, %arg1: memref<1xi32, #tpu.memory_space<smem>>) -> (i32, i32) {
    %c0_i32 = arith.constant 0 : i32
    %c0_i32_0 = arith.constant 0 : i32
    %c0_i32_1 = arith.constant 0 : i32
    return %c0_i32, %c0_i32_0 : i32, i32
  }
  func.func @transform_4(%arg0: i32, %arg1: memref<1xi32, #tpu.memory_space<smem>>) -> (i32, i32) {
    %c0_i32 = arith.constant 0 : i32
    %c0_i32_0 = arith.constant 0 : i32
    %c0_i32_1 = arith.constant 0 : i32
    return %c0_i32, %c0_i32_0 : i32, i32
  }
  func.func @transform_5(%arg0: i32, %arg1: memref<1xi32, #tpu.memory_space<smem>>) -> (i32, i32) {
    %c0_i32 = arith.constant 0 : i32
    %c0_i32_0 = arith.constant 0 : i32
    return %arg0, %c0_i32 : i32, i32
  }
}

</mosaic_0001>

<bundles_post_ra>
// kernel: tpu_custom_call.1
= control target key start
LH: loop header
LB: loop body
LE: loop exit
PB: predicated region body
PF: predicated region fallthrough
CT: control target
= control target key end

     0   :  { %12 = vsyncpa [#allocation5], 0  ;;  %s412_s0 = inlined_call_operand.<no memory space> [shape: s32[1], index: 0, kind: input, shape index: {}]   ;;  %s413_s1 = inlined_call_operand.hbm [shape: f32[16,32], index: 1, kind: input, shape index: {}]   ;;  %s414_s2 = inlined_call_operand.vmem [shape: f32[1,32], index: 2, kind: input, shape index: {}]   ;;  %s415_s3 = inlined_call_operand.vmem [shape: f32[1,32], index: 3, kind: input, shape index: {}]   ;;  %s416_s4 = inlined_call_operand.hbm [shape: f32[32,32], index: 4, kind: input, shape index: {}]   ;;  %s417_s5 = inlined_call_operand.vmem [shape: f32[1,32], index: 5, kind: input, shape index: {}]   ;;  %s418_s6 = inlined_call_operand.hbm [shape: f32[16,32], index: 6, kind: output, shape index: {}]  }
   0x1   :  { %13 = vsyncpa [#allocation8], 0 }
   0x2   :  { %14 = vsyncpa [#allocation6], 0  ;;  %s19_s23 = sshll.u32 %s413_s1, 4  ;;  %s323_s24 = smov [#allocation4]   ;;  %s20_s23 = int_to_ptr.hbm [resolvable:$true] %s19_s23 }
   0x3   :  { %s21_s25 = sshll.u32 %s323_s24, 4  ;;  %s36_s28 = sshll.u32 %s416_s4, 4  ;;  %s22_s25 = int_to_ptr.vmem [resolvable:$true] %s21_s25  ;;  %s37_s28 = int_to_ptr.hbm [resolvable:$true] %s36_s28 }
   0x4   :  { %s324_s29 = smov 128   ;;  %s325_s30 = smov 8  }
   0x5   :  { %27 = dma.hbm_to_vmem [thread:$0]  %s20_s23, 256, %s22_s25, [#allocation5], %s324_s29, %s324_s29, %s325_s30  }
   0x6   :  { %s326_s7 = smov [#allocation7]  }
   0x7   :  { %s38_s8 = sshll.u32 %s326_s7, 4  ;;  %s39_s8 = int_to_ptr.vmem [resolvable:$true] %s38_s8 }
   0x8   :  { %44 = dma.hbm_to_vmem [thread:$0]  %s37_s28, 512, %s39_s8, [#allocation8], %s324_s29, %s324_s29, %s325_s30  }
   0x9   :  { %317 = dma.done.wait [#allocation5], 256  }
   0xa   :  { %318 = vsyncadd [#allocation5], 4294967040 }
   0xb   :  { %319 = dma.done.wait [#allocation8], 512  }
   0xc   :  { %320 = vsyncadd [#allocation8], 4294966784  ;;  %vm57_vm0 = vcmask 261120   ;;  %v376_v0 = vld [vmem:[#allocation4] sm:$0xff]  ;;  %v380_v2 = vld [vmem:[#allocation4 + $0x8] sm:$0xff]  ;;  %v327_v4 = vmov 32.0   ;;  %v159_v53 = vlaneseq }
   0xd   :  { %v58_v1 = vsel %vm57_vm0, %v376_v0, 0.0  ;;  %v61_v3 = vsel %vm57_vm0, %v380_v2, 0.0  ;;  %239 = vrcp.f32 %v327_v4  ;;  %v124_v21 = vld [vmem:[#allocation7 + $0x18] sm:$0xff]  ;;  %v123_v22 = vld [vmem:[#allocation7 + $0x10] sm:$0xff]  ;;  %v122_v23 = vld [vmem:[#allocation7 + $0x8] sm:$0xff]  ;;  %s328_s13 = smov [#allocation9]  }
   0xe   :  { %59 = vadd.xlane.f32.xlu0 %v58_v1  ;;  %147 = vmatpush.msra.mxu0 %v124_v21  ;;  %v121_v24 = vld [vmem:[#allocation7] sm:$0xff]  ;;  %v236_v39 = vld [vmem:[%s414_s2] ss:$0 sm:$0xff]  ;;  %v160_v54 = vshrl.u32 %v159_v53, 7  ;;  %v166_v55 = vand.u32 127, %v159_v53  ;;  %s208_s14 = sshll.u32 %s328_s13, 4  ;;  %s209_s14 = int_to_ptr.vmem [resolvable:$true] %s208_s14 }
   0xf   :  { %226 = vmatpush.msra.mxu1 %v124_v21  ;;  %v237_v43 = vld [vmem:[%s415_s3] ss:$0 sm:$0xff]  ;;  %s172_s11 = smul.u32 2654435769, %s412_s0  ;;  %s210_s16 = sshll.u32 %s418_s6, 4  ;;  %s211_s16 = int_to_ptr.hbm [resolvable:$true] %s210_s16 }
  0x10   :  { %148 = vmatpush.msra.mxu0 %v123_v22  ;;  %v167_v56 = vmul.u32 32, %v160_v54  ;;  %v161_v58 = vadd.s32 8, %v160_v54 }
  0x11   :  { %227 = vmatpush.msra.mxu1 %v123_v22  ;;  %v173_v59 = vstv %s172_s11 }
  0x12   :  { %149 = vmatpush.msra.mxu0 %v122_v23  ;;  %v169_v57 = vadd.s32 %v167_v56, %v166_v55  ;;  %v168_v61 = vmul.u32 32, %v161_v58 }
  0x13   :  { %v240_v5 = vpop.eup %239  ;;  %228 = vmatpush.msra.mxu1 %v122_v23 }
  0x14   :  { %v65_v6 = vmul.f32 32.0, %v240_v5  ;;  %vm69_vm1 = vweird.f32 %v240_v5  ;;  %150 = vmatpush.msra.mxu0 %v121_v24  ;;  %v174_v60 = vadd.s32 %v173_v59, %v169_v57  ;;  %v170_v63 = vadd.s32 %v168_v61, %v166_v55 }
  0x15   :  { %229 = vmatpush.msra.mxu1 %v121_v24 }
  0x16   :  { %62 = vadd.xlane.f32.xlu0 %v61_v3  ;;  %v66_v7 = vsub.f32 1.0, %v65_v6  ;;  %v176_v62 = vshrl.u32 %v174_v60, 16  ;;  %v175_v3 = vadd.s32 %v173_v59, %v170_v63 }
  0x18   :  { %v67_v8 = vmul.f32 %v240_v5, %v66_v7  ;;  %v178_v1 = vxor.u32 %v176_v62, %v174_v60 }
  0x1a   :  { %v68_v9 = vadd.f32 %v240_v5, %v67_v8  ;;  %v180_v4 = vmul.u32 2146121005, %v178_v1 }
  0x1c   :  { %v70_v10 = vsel %vm69_vm1, %v240_v5, %v68_v9  ;;  %v177_v5 = vshrl.u32 %v175_v3, 16  ;;  %v182_v6 = vshrl.u32 %v180_v4, 15 }
  0x1e   :  { %v179_v7 = vxor.u32 %v177_v5, %v175_v3  ;;  %v184_v8 = vxor.u32 %v182_v6, %v180_v4 }
  0x20   :  { %v181_v9 = vmul.u32 2146121005, %v179_v7 }
  0x81   :  { %v60_v11 = vpop.xlane.xlu0 %59 }
  0x82   :  { %v71_v12 = vmul.f32 %v70_v10, %v60_v11  ;;  %v183_v11 = vshrl.u32 %v181_v9, 15 }
  0x84   :  { %v73_v13 = vsub.f32 %v376_v0, %v71_v12 }
  0x86   :  { %v75_v14 = vmul.f32 %v73_v13, %v73_v13 }
  0x88   :  { %v77_v15 = vsel %vm57_vm0, %v75_v14, 0.0 }
  0x89   :  { %78 = vadd.xlane.f32.xlu1 %v77_v15  ;;  %v63_v16 = vpop.xlane.xlu0 %62 }
  0x8a   :  { %v72_v17 = vmul.f32 %v70_v10, %v63_v16  ;;  %v238_v16 = vld [vmem:[%s417_s5] ss:$0 sm:$0xff] }
  0x8c   :  { %v74_v18 = vsub.f32 %v380_v2, %v72_v17 }
  0x8e   :  { %v76_v19 = vmul.f32 %v74_v18, %v74_v18 }
  0x90   :  { %v80_v20 = vsel %vm57_vm0, %v76_v19, 0.0 }
  0x91   :  { %81 = vadd.xlane.f32.xlu1 %v80_v20 }
  0xfc   :  { %v79_v25 = vpop.xlane.xlu1 %78 }
  0xfd   :  { %v83_v26 = vmul.f32 %v79_v25, %v70_v10 }
  0xff   :  { %v85_v27 = vadd.f32 1e-05, %v83_v26 }
 0x101   :  { %241 = vrsqrt.f32 %v85_v27  ;;  %vm93_vm3 = vweird.f32 %v85_v27 }
 0x104   :  { %v82_v28 = vpop.xlane.xlu1 %81 }
 0x105   :  { %v84_v29 = vmul.f32 %v82_v28, %v70_v10  ;;  %v186_v10 = vmul.u32 2221713035, %v184_v8 }
 0x107   :  { %v242_v30 = vpop.eup %241  ;;  %v86_v31 = vadd.f32 1e-05, %v84_v29  ;;  %v188_v12 = vshrl.u32 %v186_v10, 16 }
 0x108   :  { %v88_v32 = vmul.f32 %v242_v30, %v85_v27  ;;  %vm94_vm2 = vweird.f32 %v242_v30 }
 0x109   :  { %243 = vrsqrt.f32 %v86_v31  ;;  %vm95_vm4 = vmor %vm93_vm3, %vm94_vm2  ;;  %vm103_vm6 = vweird.f32 %v86_v31  ;;  %v190_v14 = vxor.u32 %v188_v12, %v186_v10 }
 0x10a   :  { %v89_v33 = vmul.f32 %v242_v30, %v88_v32 }
 0x10b   :  { %v192_v17 = vshrl.u32 %v190_v14, 1 }
 0x10c   :  { %v90_v34 = vmul.f32 0.5, %v89_v33 }
 0x10d   :  { %vm194_vm8 = vcmp.ge.s32.totalorder %v192_v17, 214748365 }
 0x10e   :  { %v91_v35 = vsub.f32 1.5, %v90_v34 }
 0x10f   :  { %v244_v36 = vpop.eup %243 }
 0x110   :  { %v92_v37 = vmul.f32 %v242_v30, %v91_v35  ;;  %v98_v38 = vmul.f32 %v244_v36, %v86_v31  ;;  %vm104_vm5 = vweird.f32 %v244_v36 }
 0x111   :  { %vm105_vm7 = vmor %vm103_vm6, %vm104_vm5 }
 0x112   :  { %v96_v40 = vsel %vm95_vm4, %v242_v30, %v92_v37  ;;  %v99_v41 = vmul.f32 %v244_v36, %v98_v38 }
 0x113   :  { %v107_v42 = vmul.f32 %v96_v40, %v73_v13  ;;  %v185_v13 = vxor.u32 %v183_v11, %v181_v9 }
 0x114   :  { %v100_v44 = vmul.f32 0.5, %v99_v41 }
 0x115   :  { %v113_v45 = vmul.f32 %v236_v39, %v107_v42  ;;  %v187_v15 = vmul.u32 2221713035, %v185_v13 }
 0x116   :  { %v101_v46 = vsub.f32 1.5, %v100_v44 }
 0x117   :  { %v119_v47 = vadd.f32 %v237_v43, %v113_v45 }
 0x118   :  { %v102_v48 = vmul.f32 %v244_v36, %v101_v46 }
 0x119   :  { %224 = vmatmul.msk.f32.vlgmr.msra.gmra.mxu0 %vm57_vm0, %v119_v47 }
 0x11a   :  { %v106_v49 = vsel %vm105_vm7, %v244_v36, %v102_v48 }
 0x11b   :  { %v108_v50 = vmul.f32 %v106_v49, %v74_v18  ;;  %v189_v18 = vshrl.u32 %v187_v15, 16 }
 0x11d   :  { %v114_v51 = vmul.f32 %v236_v39, %v108_v50  ;;  %v191_v21 = vxor.u32 %v189_v18, %v187_v15 }
 0x11f   :  { %v120_v52 = vadd.f32 %v237_v43, %v114_v51  ;;  %v193_v25 = vshrl.u32 %v191_v21, 1 }
 0x121   :  { %225 = vmatmul.msk.f32.vlgmr.msra.gmra.mxu1 %vm57_vm0, %v120_v52  ;;  %vm195_vm9 = vcmp.ge.s32.totalorder %v193_v25, 214748365 }
 0x196   :  { %v152_v19 = vpop.f32.mrf.mxu0 }
 0x197   :  { %v153_v20 = vadd.f32 %v238_v16, %v152_v19 }
 0x199   :  { %v196_v22 = vmul.f32 1.1111112, %v153_v20 }
 0x19b   :  { %v198_v23 = vsel %vm194_vm8, %v196_v22, 0.0 }
 0x19c   :  { %v200_v24 = vadd.f32 %v198_v23, %v376_v0 }
 0x19e   :  { %202 = vst.msk [vmem:[#allocation9] sm:$0xff] %vm57_vm0, %v200_v24  ;;  %v155_v26 = vpop.f32.mrf.mxu1 }
 0x19f   :  { %v156_v27 = vadd.f32 %v238_v16, %v155_v26 }
 0x1a1   :  { %v197_v28 = vmul.f32 1.1111112, %v156_v27 }
 0x1a3   :  { %v199_v29 = vsel %vm195_vm9, %v197_v28, 0.0 }
 0x1a4   :  { %v201_v30 = vadd.f32 %v199_v29, %v380_v2 }
 0x1a6   :  { %203 = vst.msk [vmem:[#allocation9 + $0x8] sm:$0xff] %vm57_vm0, %v201_v30 }
 0x1a7   :  { %216 = dma.vmem_to_hbm [thread:$0]  %s209_s14, 256, %s211_s16, [#allocation6], %s324_s29, %s324_s29, %s325_s30  }
 0x1a8   :  { %321 = dma.done.wait [#allocation6], 256  }
 0x1a9   :  { %322 = vsyncadd [#allocation6], 4294967040 }
 0x1aa   :  { %221 = vsyncpa [#allocation5], 1 }
 0x1ab   :  { %222 = vsyncpa [#allocation8], 1 }
 0x1ac   :  { %223 = vsyncpa [#allocation6], 1 }

</bundles_post_ra>
